<compile_context>
chip_gen: v6e
topology: v6e:2x2x1
jax: 0.10.0
libtpu: 0.0.40
codegen_flags: <defaults>
</compile_context>

<pallas_src>
import jax
import jax.numpy as jnp
from jax import lax
from jax.experimental import pallas as pl
from jax.experimental.pallas import tpu as pltpu


# ----------------------------------------------------------------------------
# Kernels
# ----------------------------------------------------------------------------

def _slab_kernel(x_ref, w1_ref, b1_ref, w2_ref, o_ref):
    """Whole sequence resident: one grid step handles a (TB, S, D) batch slab."""
    TB, S, D = x_ref.shape
    H = w1_ref.shape[1]

    x = x_ref[...].astype(jnp.float32)                           # (TB, S, D)

    # ---- Linear(D, H) + tanh: one MXU matmul over TB*S rows. ----
    x2 = x.reshape(TB * S, D)
    h = jnp.tanh(
        jnp.dot(x2, w1_ref[...], preferred_element_type=jnp.float32)
        + b1_ref[...]                                            # (1, H)
    ).reshape(TB, S, H)

    # ---- Linear(H, 1) as VPU multiply + lane reduce (b2 cancels in softmax).
    scores = jnp.sum(h * w2_ref[...], axis=-1)                   # (TB, S) lane-dense

    # ---- softmax over seq, per batch row (lane-dense intermediates). ----
    m = jnp.max(scores, axis=-1, keepdims=True)                  # (TB, 1)
    e = jnp.exp(scores - m)                                      # (TB, S)
    denom = jnp.sum(e, axis=-1, keepdims=True)                   # (TB, 1)
    p = e * pl.reciprocal(denom, approx=False)                   # (TB, S)

    # ---- weighted sum over seq. ----
    pooled = jnp.sum(p[:, :, None] * x, axis=1)                  # (TB, D)
    o_ref[...] = pooled.astype(o_ref.dtype)


def _make_flash_kernel(seq_len):
    """Seq-tiled path: 2-D grid (batch block, seq tile), online softmax."""

    def kernel(x_ref, w1_ref, b1_ref, w2_ref, o_ref, m_sc, l_sc, acc_sc):
        TB, TS, D = x_ref.shape
        H = w1_ref.shape[1]
        s_idx = pl.program_id(1)

        @pl.when(s_idx == 0)
        def _init():
            m_sc[...] = jnp.full_like(m_sc, -jnp.inf)
            l_sc[...] = jnp.zeros_like(l_sc)
            acc_sc[...] = jnp.zeros_like(acc_sc)

        x = x_ref[...].astype(jnp.float32)                       # (TB, TS, D)

        # Mask ragged seq tail: zero garbage rows and force -inf scores so
        # padded rows get exactly zero attention weight (and no NaN leakage).
        row = s_idx * TS + lax.broadcasted_iota(jnp.int32, (TB, TS), 1)
        valid = row < seq_len                                    # (TB, TS) bool
        x = jnp.where(valid[:, :, None], x, 0.0)

        x2 = x.reshape(TB * TS, D)                               # TS % 8 == 0
        h = jnp.tanh(
            jnp.dot(x2, w1_ref[...], preferred_element_type=jnp.float32)
            + b1_ref[...]
        ).reshape(TB, TS, H)
        scores = jnp.sum(h * w2_ref[...], axis=-1)               # (TB, TS)
        scores = jnp.where(valid, scores, -jnp.inf)

        # ---- online softmax update. ----
        m_prev = m_sc[...]                                       # (TB, 1)
        m_new = jnp.maximum(m_prev, jnp.max(scores, axis=-1, keepdims=True))
        alpha = jnp.exp(m_prev - m_new)                          # (TB, 1)
        e = jnp.exp(scores - m_new)                              # (TB, TS)
        l_sc[...] = alpha * l_sc[...] + jnp.sum(e, axis=-1, keepdims=True)
        acc_sc[...] = alpha * acc_sc[...] + jnp.sum(e[:, :, None] * x, axis=1)
        m_sc[...] = m_new

        @pl.when(s_idx == pl.num_programs(1) - 1)
        def _finalize():
            o_ref[...] = (acc_sc[...] *
                          pl.reciprocal(l_sc[...], approx=False)).astype(o_ref.dtype)

    return kernel


# ----------------------------------------------------------------------------
# Tiling heuristics
# ----------------------------------------------------------------------------

def _round_up(v, m):
    return ((v + m - 1) // m) * m


def _vmem_capacity_bytes():
    try:
        return int(pltpu.get_tpu_info().vmem_capacity_bytes)
    except Exception:
        return 64 << 20   # conservative fallback (v7x per-TensorCore budget)


def _choose_plan(B, S, D, dtype_bytes, vmem_cap):
    """Returns ("slab", TB, S) or ("flash", TB, TS)."""
    # Per-step x slab target: large (bandwidth-bound kernel), but leaving room
    # for the double buffer, W1, the (TB*S, H) intermediate and the output.
    slab_target = (12 << 20) if vmem_cap >= (96 << 20) else (7 << 20)
    row_bytes = S * D * dtype_bytes

    if 8 * row_bytes <= slab_target:
        # Whole sequences fit comfortably: 1-D batch-blocked grid.
        tb_cap = slab_target // row_bytes
        if tb_cap >= B:
            tb = B
            # Keep >= 2 "parallel" grid steps so both v7x TensorCores get work
            # (only when blocks can remain multiples of 8 for dense stores).
            if B >= 16:
                half = _round_up(pl.cdiv(B, 2), 8)
                if half < B:
                    tb = half
        else:
            tb = max(8, (tb_cap // 8) * 8)       # multiple of 8 -> dense (TB,D) stores
        return ("slab", tb, S)

    # Long sequences: seq-tiled online softmax.  TB*TS easily exceeds the MXU
    # M target (>=256) while the slab stays within the VMEM budget.
    tb = B if B < 8 else 8
    ts_cap = max(8, ((slab_target // max(1, tb * D * dtype_bytes)) // 8) * 8)
    ts_cap = min(ts_cap, _round_up(S, 8))
    ts = ts_cap
    for cand in range(ts_cap, 7, -8):            # prefer TS | S (no ragged tail)
        if S % cand == 0:
            ts = cand
            break
    return ("flash", tb, ts)


# ----------------------------------------------------------------------------
# Wrapper
# ----------------------------------------------------------------------------

def attention_pooling(x, w1, b1, w2, b2=None, *, plan=None):
    """x: (B, S, D); returns (B, D).  Matches AttentionPooling.forward.

    Passing x as bf16 halves HBM traffic (the kernel is bandwidth-bound) while
    all math stays f32; gate on your accuracy budget (breaks 1e-5 checks).
    """
    B, S, D = x.shape
    H = w1.shape[1]
    del b2  # softmax over seq is shift-invariant -> Linear(128,1) bias cancels

    b1_2d = b1.reshape(1, H)
    w2_row = w2.reshape(1, H)          # (H,1) -> (1,H) row for the VPU reduce

    dtype_bytes = jnp.dtype(x.dtype).itemsize
    vmem_cap = _vmem_capacity_bytes()
    if plan is None:
        plan = _choose_plan(B, S, D, dtype_bytes, vmem_cap)
    kind, tb, ts = plan

    # Generation-aware scoped-VMEM limit (v5e default is only 16 MiB; v7x has
    # 64 MiB physical per TC) so the larger tiles actually compile everywhere.
    vmem_limit = max(32 << 20, min(int(0.75 * vmem_cap), 96 << 20))

    if kind == "slab":
        return pl.pallas_call(
            _slab_kernel,
            out_shape=jax.ShapeDtypeStruct((B, D), x.dtype),
            grid_spec=pltpu.PrefetchScalarGridSpec(
                num_scalar_prefetch=0,
                grid=(pl.cdiv(B, tb),),
                in_specs=[
                    pl.BlockSpec((tb, S, D), lambda b: (b, 0, 0)),   # x batch slab
                    pl.BlockSpec((D, H), lambda b: (0, 0)),          # W1 (resident)
                    pl.BlockSpec((1, H), lambda b: (0, 0)),          # b1 (resident)
                    pl.BlockSpec((1, H), lambda b: (0, 0)),          # W2 row (resident)
                ],
                out_specs=pl.BlockSpec((tb, D), lambda b: (b, 0)),   # dense stores
            ),
            compiler_params=pltpu.CompilerParams(
                dimension_semantics=("parallel",),
                vmem_limit_bytes=vmem_limit,
            ),
        )(x, w1, b1_2d, w2_row)

    # Seq-tiled online-softmax path.
    kernel = _make_flash_kernel(S)
    return pl.pallas_call(
        kernel,
        out_shape=jax.ShapeDtypeStruct((B, D), x.dtype),
        grid_spec=pltpu.PrefetchScalarGridSpec(
            num_scalar_prefetch=0,
            grid=(pl.cdiv(B, tb), pl.cdiv(S, ts)),
            in_specs=[
                pl.BlockSpec((tb, ts, D), lambda b, s: (b, s, 0)),   # x (batch, seq) tile
                pl.BlockSpec((D, H), lambda b, s: (0, 0)),           # W1 (resident)
                pl.BlockSpec((1, H), lambda b, s: (0, 0)),           # b1 (resident)
                pl.BlockSpec((1, H), lambda b, s: (0, 0)),           # W2 row (resident)
            ],
            out_specs=pl.BlockSpec((tb, D), lambda b, s: (b, 0)),    # resident accumulator
            scratch_shapes=[
                pltpu.VMEM((tb, 1), jnp.float32),    # running max m
                pltpu.VMEM((tb, 1), jnp.float32),    # running denom l
                pltpu.VMEM((tb, D), jnp.float32),    # running weighted sum
            ],
        ),
        compiler_params=pltpu.CompilerParams(
            dimension_semantics=("parallel", "arbitrary"),
            vmem_limit_bytes=vmem_limit,
        ),
    )(x, w1, b1_2d, w2_row)


# ----------------------------------------------------------------------------
# Reference + self-test
# ----------------------------------------------------------------------------

def _reference(x, w1, b1, w2, b2):
    # Pure-JAX reference mirroring the PyTorch forward exactly (b2 included;
    # the kernel drops it because softmax is shift-invariant).
    h = jnp.tanh(x @ w1 + b1)                  # (B, S, 128)
    scores = h @ w2 + b2                       # (B, S, 1)
    weights = jax.nn.softmax(scores, axis=1)   # softmax over seq
    pooled = jnp.einsum("bsk,bsd->bkd", weights, x)[:, 0, :]
    return pooled


if __name__ == "__main__":
    # Small shapes consistent with the module's forward.
    B, S, D, H = 2, 8, 32, 128

    key = jax.random.PRNGKey(0)
    kx, kw1, kb1, kw2, kb2 = jax.random.split(key, 5)

    x = jax.random.normal(kx, (B, S, D), dtype=jnp.float32)

    # Deterministic init matching nn.Linear default (U(-1/sqrt(fan_in), ...)).
    lim1 = 1.0 / (D ** 0.5)
    w1 = jax.random.uniform(kw1, (D, H), jnp.float32, -lim1, lim1)
    b1 = jax.random.uniform(kb1, (H,), jnp.float32, -lim1, lim1)
    lim2 = 1.0 / (H ** 0.5)
    w2 = jax.random.uniform(kw2, (H, 1), jnp.float32, -lim2, lim2)
    b2 = jax.random.uniform(kb2, (1,), jnp.float32, -lim2, lim2)

    # Default (single-slab) path.
    out = attention_pooling(x, w1, b1, w2, b2)
    out = jax.block_until_ready(out)
    ref = _reference(x, w1, b1, w2, b2)
    assert out.shape == (B, D), out.shape
    assert jnp.allclose(out, ref, atol=1e-5, rtol=1e-5), (
        f"slab path max abs err {float(jnp.max(jnp.abs(out - ref)))}"
    )

    # Also exercise the seq-tiled online-softmax path at a small shape
    # (ragged last seq tile + TB == B block) to validate the masking logic.
    B2, S2 = 3, 40
    x2 = jax.random.normal(jax.random.PRNGKey(1), (B2, S2, D), dtype=jnp.float32)
    out2 = attention_pooling(x2, w1, b1, w2, b2, plan=("flash", B2, 16))
    out2 = jax.block_until_ready(out2)
    ref2 = _reference(x2, w1, b1, w2, b2)
    assert out2.shape == (B2, D), out2.shape
    assert jnp.allclose(out2, ref2, atol=1e-5, rtol=1e-5), (
        f"flash path max abs err {float(jnp.max(jnp.abs(out2 - ref2)))}"
    )

    print("KERNEL_OK")
</pallas_src>

<mosaic_0001>
module attributes {stable_mosaic.version = 11 : i64} {
  func.func @_slab_kernel(%arg0: i32, %arg1: memref<2x8x32xf32, #tpu.memory_space<vmem>>, %arg2: memref<32x128xf32, #tpu.memory_space<vmem>>, %arg3: memref<1x128xf32, #tpu.memory_space<vmem>>, %arg4: memref<1x128xf32, #tpu.memory_space<vmem>>, %arg5: memref<2x32xf32, #tpu.memory_space<vmem>>) attributes {dimension_semantics = [#tpu.dimension_semantics<parallel>], iteration_bounds = array<i64: 1>, scalar_prefetch = 0 : i64, scratch_operands = 0 : i64, tpu.core_type = #tpu.core_type<tc>, window_params = [{transform_indices = @transform_0, window_bounds = array<i64: 2, 8, 32>}, {pipeline_mode = #tpu.pipeline_mode<synchronous>, transform_indices = @transform_1, window_bounds = array<i64: 32, 128>}, {pipeline_mode = #tpu.pipeline_mode<synchronous>, transform_indices = @transform_2, window_bounds = array<i64: 1, 128>}, {pipeline_mode = #tpu.pipeline_mode<synchronous>, transform_indices = @transform_3, window_bounds = array<i64: 1, 128>}, {transform_indices = @transform_4, window_bounds = array<i64: 2, 32>}]} {
    %c0 = arith.constant 0 : index
    %c0_0 = arith.constant 0 : index
    %c0_1 = arith.constant 0 : index
    %0 = vector.load %arg1[%c0, %c0_0, %c0_1] : memref<2x8x32xf32, #tpu.memory_space<vmem>>, vector<2x8x32xf32>
    %1 = vector.shape_cast %0 : vector<2x8x32xf32> to vector<16x32xf32>
    %c0_2 = arith.constant 0 : index
    %c0_3 = arith.constant 0 : index
    %2 = vector.load %arg2[%c0_2, %c0_3] : memref<32x128xf32, #tpu.memory_space<vmem>>, vector<32x128xf32>
    %cst = arith.constant dense<0.000000e+00> : vector<16x128xf32>
    %3 = tpu.matmul %1, %2, %cst {dimension_numbers = #tpu.dot_dimension_numbers<[1], [0], [0], [1], [0, 0, 1, 1], [], []>} : vector<16x32xf32>, vector<32x128xf32>, vector<16x128xf32> -> vector<16x128xf32>
    %c0_4 = arith.constant 0 : index
    %c0_5 = arith.constant 0 : index
    %4 = vector.load %arg3[%c0_4, %c0_5] : memref<1x128xf32, #tpu.memory_space<vmem>>, vector<1x128xf32>
    %5 = vector.broadcast %4 : vector<1x128xf32> to vector<16x128xf32>
    %6 = arith.addf %3, %5 : vector<16x128xf32>
    %7 = math.tanh %6 : vector<16x128xf32>
    %8 = vector.shape_cast %7 : vector<16x128xf32> to vector<2x8x128xf32>
    %c0_6 = arith.constant 0 : index
    %c0_7 = arith.constant 0 : index
    %9 = vector.load %arg4[%c0_6, %c0_7] : memref<1x128xf32, #tpu.memory_space<vmem>>, vector<1x128xf32>
    %10 = vector.shape_cast %9 : vector<1x128xf32> to vector<1x1x128xf32>
    %11 = vector.broadcast %10 : vector<1x1x128xf32> to vector<2x8x128xf32>
    %12 = arith.mulf %8, %11 : vector<2x8x128xf32>
    %cst_8 = arith.constant dense<0.000000e+00> : vector<2x8xf32>
    %13 = vector.multi_reduction <add>, %12, %cst_8 [2] : vector<2x8x128xf32> to vector<2x8xf32>
    %cst_9 = arith.constant dense<0xFF800000> : vector<2xf32>
    %14 = vector.multi_reduction <maximumf>, %13, %cst_9 [1] : vector<2x8xf32> to vector<2xf32>
    %15 = vector.shape_cast %14 : vector<2xf32> to vector<2x1xf32>
    %16 = vector.broadcast %15 : vector<2x1xf32> to vector<2x8xf32>
    %17 = arith.subf %13, %16 : vector<2x8xf32>
    %18 = math.exp %17 : vector<2x8xf32>
    %cst_10 = arith.constant dense<0.000000e+00> : vector<2xf32>
    %19 = vector.multi_reduction <add>, %18, %cst_10 [1] : vector<2x8xf32> to vector<2xf32>
    %20 = vector.shape_cast %19 : vector<2xf32> to vector<2x1xf32>
    %21 = tpu.reciprocal %20 : vector<2x1xf32> -> vector<2x1xf32>
    %22 = vector.broadcast %21 : vector<2x1xf32> to vector<2x8xf32>
    %23 = arith.mulf %18, %22 : vector<2x8xf32>
    %24 = vector.shape_cast %23 : vector<2x8xf32> to vector<2x8x1xf32>
    %25 = vector.broadcast %24 : vector<2x8x1xf32> to vector<2x8x32xf32>
    %26 = arith.mulf %25, %0 : vector<2x8x32xf32>
    %cst_11 = arith.constant dense<0.000000e+00> : vector<2x32xf32>
    %27 = vector.multi_reduction <add>, %26, %cst_11 [1] : vector<2x8x32xf32> to vector<2x32xf32>
    %c0_12 = arith.constant 0 : index
    %c0_13 = arith.constant 0 : index
    %28 = vector.load %arg5[%c0_12, %c0_13] : memref<2x32xf32, #tpu.memory_space<vmem>>, vector<2x32xf32>
    tpu.vector_store %arg5[%c0_12, %c0_13], %27 {strides = array<i32>} : memref<2x32xf32, #tpu.memory_space<vmem>>, vector<2x32xf32>,
    return
  }
  func.func @transform_0(%arg0: i32) -> (i32, i32, i32) {
    %c0_i32 = arith.constant 0 : i32
    %c0_i32_0 = arith.constant 0 : i32
    %c0_i32_1 = arith.constant 0 : i32
    return %arg0, %c0_i32, %c0_i32_0 : i32, i32, i32
  }
  func.func @transform_1(%arg0: i32) -> (i32, i32) {
    %c0_i32 = arith.constant 0 : i32
    %c0_i32_0 = arith.constant 0 : i32
    %c0_i32_1 = arith.constant 0 : i32
    return %c0_i32, %c0_i32_0 : i32, i32
  }
  func.func @transform_2(%arg0: i32) -> (i32, i32) {
    %c0_i32 = arith.constant 0 : i32
    %c0_i32_0 = arith.constant 0 : i32
    %c0_i32_1 = arith.constant 0 : i32
    return %c0_i32, %c0_i32_0 : i32, i32
  }
  func.func @transform_3(%arg0: i32) -> (i32, i32) {
    %c0_i32 = arith.constant 0 : i32
    %c0_i32_0 = arith.constant 0 : i32
    %c0_i32_1 = arith.constant 0 : i32
    return %c0_i32, %c0_i32_0 : i32, i32
  }
  func.func @transform_4(%arg0: i32) -> (i32, i32) {
    %c0_i32 = arith.constant 0 : i32
    %c0_i32_0 = arith.constant 0 : i32
    return %arg0, %c0_i32 : i32, i32
  }
}

</mosaic_0001>

<bundles_post_ra>
// kernel: tpu_custom_call.1
= control target key start
LH: loop header
LB: loop body
LE: loop exit
PB: predicated region body
PF: predicated region fallthrough
CT: control target
= control target key end

     0   :  { %9 = vsyncpa [#allocation3], 0  ;;  %s443_s0 = inlined_call_operand.hbm [shape: f32[2,8,32], index: 0, kind: input, shape index: {}]   ;;  %s444_s1 = inlined_call_operand.hbm [shape: f32[32,128], index: 1, kind: input, shape index: {}]   ;;  %s445_s2 = inlined_call_operand.vmem [shape: f32[1,128], index: 2, kind: input, shape index: {}]   ;;  %s446_s3 = inlined_call_operand.vmem [shape: f32[1,128], index: 3, kind: input, shape index: {}]   ;;  %s447_s4 = inlined_call_operand.hbm [shape: f32[2,32], index: 4, kind: output, shape index: {}]  }
   0x1   :  { %10 = vsyncpa [#allocation6], 0 }
   0x2   :  { %11 = vsyncpa [#allocation4], 0  ;;  %s380_s15 = smov [#allocation2]  }
   0x3   :  { %s17_s16 = sshll.u32 %s380_s15, 4  ;;  %s18_s16 = int_to_ptr.vmem [resolvable:$true] %s17_s16 }
   0x4   :  { %s322_s17 = scalar_lea.vmem %s18_s16, 256  ;;  %p327_p1 = scmp.lt.s32.totalorder %s18_s16, %s18_s16 }
   0x5   :  { %p323_p0 = scmp.ne.s32.totalorder %s18_s16, %s322_s17  ;;  %p328_p2 = scmp.lt.s32.totalorder %s322_s17, %s322_s17 }
   0x7   :  { %p329_p3 = por %p328_p2, %p327_p1 }
   0x9   :  { %p330_p4 = pnand %p329_p3, %p323_p0 }
   0xb   :  { %333 = shalt.err (!%p330_p4)
}
   0xc   :  { %s381_s18 = smov 128   ;;  %s382_s19 = smov 8  }
   0xd   :  { %23 = dma.hbm_to_vmem [thread:$0]  %s443_s0, 256, %s18_s16, [#allocation3], %s381_s18, %s381_s18, %s382_s19  }
   0xe   :  { %s383_s22 = smov [#allocation5]  }
   0xf   :  { %s29_s23 = sshll.u32 %s383_s22, 4  ;;  %s30_s23 = int_to_ptr.vmem [resolvable:$true] %s29_s23 }
  0x10   :  { %s342_s24 = scalar_lea.vmem %s30_s23, 512  ;;  %p347_p6 = scmp.lt.s32.totalorder %s30_s23, %s30_s23 }
  0x11   :  { %p343_p5 = scmp.ne.s32.totalorder %s30_s23, %s342_s24  ;;  %p348_p7 = scmp.lt.s32.totalorder %s342_s24, %s342_s24 }
  0x13   :  { %p349_p8 = por %p348_p7, %p347_p6 }
  0x15   :  { %p350_p9 = pnand %p349_p8, %p343_p5 }
  0x17   :  { %353 = shalt.err (!%p350_p9)
}
  0x18   :  { %35 = dma.hbm_to_vmem [thread:$0]  %s444_s1, 512, %s30_s23, [#allocation6], %s381_s18, %s381_s18, %s382_s19  }
  0x19   :  { %374 = dma.done.wait [#allocation3], 256  }
  0x1a   :  { %375 = vsyncadd [#allocation3], 4294967040 }
  0x1b   :  { %376 = dma.done.wait [#allocation6], 512  }
  0x1c   :  { %377 = vsyncadd [#allocation6], 4294966784  ;;  %vm59_vm0 = vcmask 261120   ;;  %v51_v0 = vld [vmem:[#allocation5 + $0x18] sm:$0xff]  ;;  %v50_v1 = vld [vmem:[#allocation5 + $0x10] sm:$0xff]  ;;  %v158_v16 = vlaneseq  ;;  %vm168_vm1 = vcmask 1041409  }
  0x1d   :  { %285 = vmatprep.subr.mxu0 %v51_v0  ;;  %v417_v2 = vld [vmem:[#allocation2] sm:$0xff]  ;;  %v49_v3 = vld [vmem:[#allocation5 + $0x8] sm:$0xff]  ;;  %v48_v4 = vld [vmem:[#allocation5] sm:$0xff]  ;;  %vm171_vm2 = vcmask 58368   ;;  %v384_v26 = vmov 0   ;;  %vm257_vm3 = vcmask 254976  }
  0x1e   :  { %286 = vmatpush3.msra.mxu0 %v51_v0  ;;  %293 = vmatprep.mubr.msk.f32.mxu0 %vm59_vm0, %v417_v2  ;;  %v421_v5 = vld [vmem:[#allocation2 + $0x8] sm:$0xff]  ;;  %v275_v7 = vld [vmem:[%s445_s2] ss:$0 sm:$0xff]  ;;  %v159_v17 = vand.u32 127, %v158_v16  ;;  %v161_v18 = vshrl.u32 %v158_v16, 7  ;;  %s385_s2 = smov [#allocation7]  }
  0x1f   :  { %287 = vmatprep.subr.mxu0 %v50_v1  ;;  %v278_v12 = vld [vmem:[%s446_s3] ss:$0 sm:$0xff]  ;;  %303 = vset.pattern.permute.xlu0 %v384_v26  ;;  %s265_s3 = sshll.u32 %s385_s2, 4  ;;  %s266_s3 = int_to_ptr.vmem [resolvable:$true] %s265_s3 }
  0x20   :  { %288 = vmatpush3.msra.mxu0 %v50_v1  ;;  %v162_v20 = vsub.s32 %v159_v17, %v161_v18  ;;  %302 = vset.pattern.permute.xlu1 %v384_v26  ;;  %v178_v27 = vsub.s32 0, %v161_v18  ;;  %v182_v28 = vsub.s32 1, %v161_v18  ;;  %s354_s29 = scalar_lea.vmem %s266_s3, 32  ;;  %p359_p11 = scmp.lt.s32.totalorder %s266_s3, %s266_s3 }
  0x21   :  { %289 = vmatprep.subr.mxu0 %v49_v3  ;;  %p355_p10 = scmp.ne.s32.totalorder %s266_s3, %s354_s29  ;;  %p360_p12 = scmp.lt.s32.totalorder %s354_s29, %s354_s29 }
  0x22   :  { %290 = vmatpush3.msra.mxu0 %v49_v3 }
  0x23   :  { %291 = vmatprep.subr.mxu0 %v48_v4  ;;  %p361_p13 = por %p360_p12, %p359_p11 }
  0x24   :  { %292 = vmatpush3.msra.mxu0 %v48_v4 }
  0x25   :  { %294 = vmatmul.mubr.msk.f32.vlgmr.msra.gmra.mxu0 %vm59_vm0, %v421_v5  ;;  %p362_p0 = pnand %p361_p13, %p355_p10 }
  0xe5   :  { %v295_v6 = vpop.f32.mrf.mxu0 }
  0xe6   :  { %v138_v9 = vadd.f32 %v295_v6, %v275_v7 }
  0xe7   :  { %v132_v8 = vpop.f32.mrf.mxu0 }
  0xe8   :  { %v133_v10 = vadd.f32 %v275_v7, %v132_v8 }
  0xea   :  { %304 = vtanh.f32 %v133_v10 }
  0xeb   :  { %306 = vtanh.f32 %v138_v9 }
  0xf7   :  { %v305_v11 = vpop.eup %304 }
  0xf8   :  { %v150_v13 = vmul.f32 %v305_v11, %v278_v12  ;;  %v307_v14 = vpop.eup %306 }
  0xf9   :  { %v151_v15 = vmul.f32 %v307_v14, %v278_v12 }
  0xfa   :  { %152 = vadd.xlane.f32.xlu0 %v150_v13 }
  0xfe   :  { %154 = vadd.xlane.f32.xlu0 %v151_v15 }
 0x183   :  { %v153_v19 = vpop.xlane.xlu0 %152 }
 0x184   :  { %v163_v22 = vrot.slane %v153_v19, %v162_v20 }
 0x187   :  { %v155_v21 = vpop.xlane.xlu0 %154 }
 0x188   :  { %v167_v23 = vrot.slane %v155_v21, %v162_v20 }
 0x18a   :  { %v169_v24 = vsel %vm168_vm1, %v167_v23, %v163_v22 }
 0x18b   :  { %v172_v25 = vsel %vm171_vm2, %v169_v24, -inf }
 0x18c   :  { %173 = vmax.xlane.f32.xlu1 %v172_v25 }
 0x215   :  { %v174_v29 = vpop.xlane.xlu1 %173 }
 0x216   :  { %v179_v30 = vrot.slane %v174_v29, %v178_v27  ;;  %v183_v31 = vrot.slane %v174_v29, %v182_v28 }
 0x218   :  { %v186_v32 = vsub.f32 %v153_v19, %v179_v30  ;;  %v187_v33 = vsub.f32 %v155_v21, %v183_v31 }
 0x21a   :  { %v188_v34 = vmul.f32 1.442695, %v186_v32  ;;  %v190_v35 = vmul.f32 1.442695, %v187_v33 }
 0x21c   :  { %308 = vpow2.f32 %v188_v34 }
 0x21d   :  { %310 = vpow2.f32 %v190_v35 }
 0x229   :  { %v309_v36 = vpop.eup %308 }
 0x22a   :  { %v311_v37 = vpop.eup %310  ;;  %195 = vperm.xlu1 %302, %v309_v36  }
 0x22b   :  { %198 = vperm.xlu0 %303, %v311_v37  }
 0x2a5   :  { %v196_v38 = vpop.permute.xlu1 %195 }
 0x2a6   :  { %v199_v39 = vpop.permute.xlu0 %198  ;;  %v203_v40 = vrot.slane %v196_v38, %v162_v20 }
 0x2a7   :  { %v207_v41 = vrot.slane %v199_v39, %v162_v20 }
 0x2a9   :  { %v208_v42 = vsel %vm168_vm1, %v207_v41, %v203_v40 }
 0x2aa   :  { %v210_v43 = vsel %vm171_vm2, %v208_v42, 0.0 }
 0x2ab   :  { %211 = vadd.xlane.f32.xlu1 %v210_v43 }
 0x334   :  { %v212_v44 = vpop.xlane.xlu1 %211 }
 0x335   :  { %312 = vrcp.f32 %v212_v44 }
 0x342   :  { %v313_v45 = vpop.eup %312 }
 0x343   :  { %v218_v46 = vrot.slane %v313_v45, %v178_v27  ;;  %v222_v48 = vrot.slane %v313_v45, %v182_v28 }
 0x345   :  { %v225_v47 = vmul.f32 %v309_v36, %v218_v46  ;;  %v226_v49 = vmul.f32 %v311_v37, %v222_v48 }
 0x347   :  { %229 = vperm.xlu0 %303, %v225_v47  }
 0x34b   :  { %234 = vperm.xlu0 %303, %v226_v49  }
 0x3c2   :  { %v230_v50 = vpop.permute.xlu0 %229 }
 0x3c3   :  { %v237_v51 = vmul.f32 %v230_v50, %v417_v2 }
 0x3c5   :  { %v239_v52 = vsel %vm59_vm0, %v237_v51, 0.0 }
 0x3c6   :  { %v240_v53 = vrot.slane %v239_v52, 4  ;;  %v235_v54 = vpop.permute.xlu0 %234 }
 0x3c7   :  { %v238_v55 = vmul.f32 %v235_v54, %v421_v5 }
 0x3c8   :  { %v241_v56 = vadd.f32 %v240_v53, %v239_v52 }
 0x3c9   :  { %v246_v57 = vsel %vm59_vm0, %v238_v55, 0.0 }
 0x3ca   :  { %v242_v58 = vrot.slane %v241_v56, 2  ;;  %v247_v59 = vrot.slane %v246_v57, 4 }
 0x3cc   :  { %v243_v60 = vadd.f32 %v242_v58, %v241_v56  ;;  %v248_v61 = vadd.f32 %v247_v59, %v246_v57 }
 0x3ce   :  { %v249_v62 = vrot.slane %v248_v61, 2  ;;  %v244_v63 = vrot.slane %v243_v60, 1 }
 0x3d0   :  { %v250_v0 = vadd.f32 %v249_v62, %v248_v61  ;;  %v245_v2 = vadd.f32 %v244_v63, %v243_v60 }
 0x3d2   :  { %v251_v1 = vrot.slane %v250_v0, 1 }
 0x3d4   :  { %v252_v3 = vadd.f32 %v251_v1, %v250_v0 }
 0x3d6   :  { %v255_v4 = vsel %vm168_vm1, %v252_v3, %v245_v2 }
 0x3d7   :  { %258 = vst.msk [vmem:[#allocation7] sm:$0x3] %vm257_vm3, %v255_v4 }
 0x3d8   :  { %365 = shalt.err (!%p362_p0)
}
 0x3d9   :  { %268 = dma.vmem_to_hbm [thread:$0]  %s266_s3, 32, %s447_s4, [#allocation4]  }
 0x3da   :  { %378 = dma.done.wait [#allocation4], 32  }
 0x3db   :  { %379 = vsyncadd [#allocation4], 4294967264 }
 0x3dc   :  { %272 = vsyncpa [#allocation3], 1 }
 0x3dd   :  { %273 = vsyncpa [#allocation6], 1 }
 0x3de   :  { %274 = vsyncpa [#allocation4], 1 }

</bundles_post_ra>
